<compile_context>
chip_gen: v7x
topology: tpu7x:2x2x1
jax: 0.10.0
libtpu: 0.0.40
codegen_flags: <defaults>
</compile_context>

<pallas_src>
import functools

import jax
import jax.numpy as jnp
import numpy as np
from jax import lax
from jax.experimental import pallas as pl
from jax.experimental.pallas import tpu as pltpu


def _diff_loss_kernel(a_ref, b_ref, o_ref, *, tn, n_valid):
    """One grid step: cosine similarity of `tn` rows -> one lane-dense partial sum."""
    a = a_ref[...].astype(jnp.float32)
    b = b_ref[...].astype(jnp.float32)

    # Per-row squared L2 norms and dot products over the flattened (C, H, W) axis.
    sa = jnp.sum(a * a, axis=1, keepdims=True)      # (tn, 1)
    sb = jnp.sum(b * b, axis=1, keepdims=True)      # (tn, 1)
    dots = jnp.sum(a * b, axis=1, keepdims=True)    # (tn, 1)

    # F.normalize(p=2, eps=1e-12): divide by max(||x||, eps)  <=>  * rsqrt(max(||x||^2, eps^2)).
    eps2 = jnp.float32(1e-24)
    cos = dots * lax.rsqrt(jnp.maximum(sa, eps2)) * lax.rsqrt(jnp.maximum(sb, eps2))

    # Mask rows past the true N (the last tile may read out-of-bounds garbage).
    row = pl.program_id(0) * tn + lax.broadcasted_iota(jnp.int32, (tn, 1), 0)
    cos = jnp.where(row < n_valid, cos, jnp.float32(0.0))

    partial = jnp.sum(cos)
    # Lane-dense partial-sum output block for this tile (distinct block per grid
    # step -> safe to run the grid axis as "parallel").
    o_ref[...] = jnp.full((1, 1, 128), partial, dtype=jnp.float32)


def _tpu_vmem_budgets():
    """(working-set budget, vmem_limit_bytes) per TPU generation."""
    kind = ""
    try:
        kind = jax.devices()[0].device_kind.lower()
    except Exception:
        pass
    if "v7" in kind:
        # v7x: 64 MiB physical VMEM per TensorCore -> stay well under it.
        return 32 * 1024 * 1024, 44 * 1024 * 1024
    # v5e / v6e: 128 MiB physical VMEM.
    return 64 * 1024 * 1024, 96 * 1024 * 1024


def diff_loss(input_a, input_b):
    assert input_a.ndim == 5
    assert input_b.ndim == 5
    assert input_a.shape == input_b.shape

    B, T = input_a.shape[:2]
    N = B * T
    D = int(np.prod(input_a.shape[2:]))

    # Row-major flatten: layout-preserving, no HBM copy, no lane padding.
    a2 = input_a.reshape(N, D)
    b2 = input_b.reshape(N, D)

    working_budget, vmem_limit = _tpu_vmem_budgets()

    # Per-row VMEM cost: 2 inputs x 2 pipeline buffers at the input dtype, plus
    # ~3 f32-sized elementwise temporaries (upcasts, a*a, a*b) of headroom.
    itemsize = int(a2.dtype.itemsize)
    per_row_bytes = D * (4 * itemsize + 12)
    tn = (working_budget // per_row_bytes) // 8 * 8
    tn = int(max(8, min(tn, 2048, ((N + 7) // 8) * 8)))
    # TODO(synk): also tile the lane (D = C*H*W) axis if a single (8, D) f32 block
    # ever exceeds the VMEM budget (D beyond a few hundred thousand elements).

    num_tiles = (N + tn - 1) // tn

    partials = pl.pallas_call(
        functools.partial(_diff_loss_kernel, tn=tn, n_valid=N),
        out_shape=jax.ShapeDtypeStruct((num_tiles, 1, 128), jnp.float32),
        grid_spec=pltpu.PrefetchScalarGridSpec(
            num_scalar_prefetch=0,
            grid=(num_tiles,),
            in_specs=[
                pl.BlockSpec((tn, D), lambda i: (i, 0)),
                pl.BlockSpec((tn, D), lambda i: (i, 0)),
            ],
            out_specs=pl.BlockSpec((1, 1, 128), lambda i: (i, 0, 0)),
        ),
        compiler_params=pltpu.CompilerParams(
            dimension_semantics=("parallel",),
            vmem_limit_bytes=vmem_limit,
        ),
    )(a2, b2)

    # Tiny final reduction over per-tile partials + mean over the N valid rows.
    return jnp.sum(partials[:, 0, 0]) / jnp.float32(N)


def diff_loss_ref(input_a, input_b):
    """Pure-JAX reference matching the PyTorch module."""
    N = input_a.shape[0] * input_a.shape[1]
    a = input_a.reshape(N, -1).astype(jnp.float32)
    b = input_b.reshape(N, -1).astype(jnp.float32)
    eps = 1e-12
    na = jnp.maximum(jnp.linalg.norm(a, axis=1, keepdims=True), eps)
    nb = jnp.maximum(jnp.linalg.norm(b, axis=1, keepdims=True), eps)
    return jnp.mean(jnp.sum((a / na) * (b / nb), axis=1))


if __name__ == "__main__":
    key = jax.random.PRNGKey(0)
    ka, kb = jax.random.split(key)

    # Primary case: [B, T, C, H, W] = [2, 4, 4, 16, 16]  (N = 8 rows, D = 1024 lanes).
    shape = (2, 4, 4, 16, 16)
    input_a = jax.random.normal(ka, shape, dtype=jnp.float32)
    input_b = jax.random.normal(kb, shape, dtype=jnp.float32)

    loss = diff_loss(input_a, input_b)
    jax.block_until_ready(loss)
    ref = diff_loss_ref(input_a, input_b)
    np.testing.assert_allclose(np.asarray(loss), np.asarray(ref), rtol=1e-5, atol=1e-6)

    # Secondary case: D not a multiple of 128 (no lane padding needed): D = 3*9*7 = 189.
    shape2 = (2, 4, 3, 9, 7)
    ka2, kb2 = jax.random.split(jax.random.PRNGKey(1))
    input_a2 = jax.random.normal(ka2, shape2, dtype=jnp.float32)
    input_b2 = jax.random.normal(kb2, shape2, dtype=jnp.float32)

    loss2 = diff_loss(input_a2, input_b2)
    jax.block_until_ready(loss2)
    ref2 = diff_loss_ref(input_a2, input_b2)
    np.testing.assert_allclose(np.asarray(loss2), np.asarray(ref2), rtol=1e-5, atol=1e-6)

    print("KERNEL_OK")
</pallas_src>

<mosaic_0001>
module attributes {stable_mosaic.version = 11 : i64} {
  func.func @_diff_loss_kernel(%arg0: i32, %arg1: memref<8x1024xf32, #tpu.memory_space<vmem>>, %arg2: memref<8x1024xf32, #tpu.memory_space<vmem>>, %arg3: memref<1x1x128xf32, #tpu.memory_space<vmem>>) attributes {dimension_semantics = [#tpu.dimension_semantics<parallel>], iteration_bounds = array<i64: 1>, scalar_prefetch = 0 : i64, scratch_operands = 0 : i64, tpu.core_type = #tpu.core_type<tc>, window_params = [{transform_indices = @transform_0, window_bounds = array<i64: 8, 1024>}, {transform_indices = @transform_1, window_bounds = array<i64: 8, 1024>}, {transform_indices = @transform_2, window_bounds = array<i64: 1, 1, 128>}]} {
    %c0 = arith.constant 0 : index
    %c0_0 = arith.constant 0 : index
    %0 = vector.load %arg1[%c0, %c0_0] : memref<8x1024xf32, #tpu.memory_space<vmem>>, vector<8x1024xf32>
    %c0_1 = arith.constant 0 : index
    %c0_2 = arith.constant 0 : index
    %1 = vector.load %arg2[%c0_1, %c0_2] : memref<8x1024xf32, #tpu.memory_space<vmem>>, vector<8x1024xf32>
    %2 = arith.mulf %0, %0 : vector<8x1024xf32>
    %cst = arith.constant dense<0.000000e+00> : vector<8xf32>
    %3 = vector.multi_reduction <add>, %2, %cst [1] : vector<8x1024xf32> to vector<8xf32>
    %4 = vector.shape_cast %3 : vector<8xf32> to vector<8x1xf32>
    %5 = arith.mulf %1, %1 : vector<8x1024xf32>
    %cst_3 = arith.constant dense<0.000000e+00> : vector<8xf32>
    %6 = vector.multi_reduction <add>, %5, %cst_3 [1] : vector<8x1024xf32> to vector<8xf32>
    %7 = vector.shape_cast %6 : vector<8xf32> to vector<8x1xf32>
    %8 = arith.mulf %0, %1 : vector<8x1024xf32>
    %cst_4 = arith.constant dense<0.000000e+00> : vector<8xf32>
    %9 = vector.multi_reduction <add>, %8, %cst_4 [1] : vector<8x1024xf32> to vector<8xf32>
    %10 = vector.shape_cast %9 : vector<8xf32> to vector<8x1xf32>
    %cst_5 = arith.constant 1.000000e-24 : f32
    %11 = vector.broadcast %cst_5 : f32 to vector<8x1xf32>
    %12 = arith.maximumf %4, %11 : vector<8x1xf32>
    %13 = math.rsqrt %12 : vector<8x1xf32>
    %14 = arith.mulf %10, %13 : vector<8x1xf32>
    %cst_6 = arith.constant 1.000000e-24 : f32
    %15 = vector.broadcast %cst_6 : f32 to vector<8x1xf32>
    %16 = arith.maximumf %7, %15 : vector<8x1xf32>
    %17 = math.rsqrt %16 : vector<8x1xf32>
    %18 = arith.mulf %14, %17 : vector<8x1xf32>
    %c8_i32 = arith.constant 8 : i32
    %19 = arith.muli %arg0, %c8_i32 : i32
    %20 = tpu.iota {dimensions = array<i32: 0>} : vector<8x1xi32>
    %21 = vector.broadcast %19 : i32 to vector<8x1xi32>
    %22 = arith.addi %21, %20 : vector<8x1xi32>
    %c8_i32_7 = arith.constant 8 : i32
    %23 = vector.broadcast %c8_i32_7 : i32 to vector<8x1xi32>
    %24 = arith.cmpi slt, %22, %23 : vector<8x1xi32>
    %cst_8 = arith.constant 0.000000e+00 : f32
    %25 = vector.broadcast %cst_8 : f32 to vector<8x1xf32>
    %26 = arith.select %24, %18, %25 : vector<8x1xi1>, vector<8x1xf32>
    %27 = vector.shape_cast %26 : vector<8x1xf32> to vector<1x8x1xf32>
    %cst_9 = arith.constant dense<0.000000e+00> : vector<1xf32>
    %28 = vector.multi_reduction <add>, %27, %cst_9 [1, 2] : vector<1x8x1xf32> to vector<1xf32>
    %29 = vector.shape_cast %28 : vector<1xf32> to vector<1x1x1xf32>
    %30 = vector.extract %29[0, 0, 0] : f32 from vector<1x1x1xf32>
    %31 = vector.broadcast %30 : f32 to vector<1x1x128xf32>
    %c0_10 = arith.constant 0 : index
    %c0_11 = arith.constant 0 : index
    %c0_12 = arith.constant 0 : index
    %32 = vector.load %arg3[%c0_10, %c0_11, %c0_12] : memref<1x1x128xf32, #tpu.memory_space<vmem>>, vector<1x1x128xf32>
    tpu.vector_store %arg3[%c0_10, %c0_11, %c0_12], %31 {strides = array<i32>} : memref<1x1x128xf32, #tpu.memory_space<vmem>>, vector<1x1x128xf32>,
    return
  }
  func.func @transform_0(%arg0: i32) -> (i32, i32) {
    %c0_i32 = arith.constant 0 : i32
    %c0_i32_0 = arith.constant 0 : i32
    return %arg0, %c0_i32 : i32, i32
  }
  func.func @transform_1(%arg0: i32) -> (i32, i32) {
    %c0_i32 = arith.constant 0 : i32
    %c0_i32_0 = arith.constant 0 : i32
    return %arg0, %c0_i32 : i32, i32
  }
  func.func @transform_2(%arg0: i32) -> (i32, i32, i32) {
    %c0_i32 = arith.constant 0 : i32
    %c0_i32_0 = arith.constant 0 : i32
    %c0_i32_1 = arith.constant 0 : i32
    return %arg0, %c0_i32, %c0_i32_0 : i32, i32, i32
  }
}

</mosaic_0001>

<bundles_post_ra>
// kernel: tpu_custom_call.1
= control target key start
LH: loop header
LB: loop body
LE: loop exit
PB: predicated region body
PF: predicated region fallthrough
CT: control target
= control target key end

     0   :  { %7 = vsyncpa [#allocation3], 0  ;;  %s280_s0 = inlined_call_operand.hbm [shape: f32[8,1024], index: 0, kind: input, shape index: {}]   ;;  %s281_s1 = inlined_call_operand.hbm [shape: f32[8,1024], index: 1, kind: input, shape index: {}]   ;;  %s282_s2 = inlined_call_operand.hbm [shape: f32[1,1,128], index: 2, kind: output, shape index: {}]  }
   0x1   :  { %8 = vsyncpa [#allocation6], 0 }
   0x2   :  { %9 = vsyncpa [#allocation4], 0  ;;  %s226_s9 = smov [#allocation2]   ;;  %s227_s11 = smov [#allocation5]  }
   0x3   :  { %s16_s10 = sshll.u32 %s226_s9, 4  ;;  %s26_s12 = sshll.u32 %s227_s11, 4  ;;  %s17_s10 = int_to_ptr.vmem [resolvable:$true] %s16_s10  ;;  %s27_s12 = int_to_ptr.vmem [resolvable:$true] %s26_s12 }
   0x4   :  { %s154_s15 = scalar_lea.hbm %s280_s0, 1024 }
   0x5   :  { %p155_p0 = scmp.ne.s32.totalorder %s280_s0, %s154_s15  ;;  %p158_p1 = scmp.lt.u32.totalorder %s154_s15, %s280_s0 }
   0x7   :  { %p160_p2 = pnand %p158_p1, %p155_p0 }
   0x9   :  { %163 = shalt.err (!%p160_p2)
}
   0xa   :  { %s164_s20 = scalar_lea.vmem %s17_s10, 1024  ;;  %p169_p4 = scmp.lt.s32.totalorder %s17_s10, %s17_s10 }
   0xb   :  { %p165_p3 = scmp.ne.s32.totalorder %s17_s10, %s164_s20  ;;  %p170_p5 = scmp.lt.s32.totalorder %s164_s20, %s164_s20 }
   0xd   :  { %p171_p6 = por %p170_p5, %p169_p4 }
   0xf   :  { %p172_p7 = pnand %p171_p6, %p165_p3 }
  0x11   :  { %175 = shalt.err (!%p172_p7)
}
  0x12   :  { %19 = dma.hbm_to_vmem [thread:$0]  %s280_s0, 1024, %s17_s10, [#allocation3]  }
  0x13   :  { %s176_s25 = scalar_lea.hbm %s281_s1, 1024 }
  0x14   :  { %p177_p8 = scmp.ne.s32.totalorder %s281_s1, %s176_s25  ;;  %p180_p9 = scmp.lt.u32.totalorder %s176_s25, %s281_s1 }
  0x16   :  { %p182_p10 = pnand %p180_p9, %p177_p8 }
  0x18   :  { %185 = shalt.err (!%p182_p10)
}
  0x19   :  { %s186_s30 = scalar_lea.vmem %s27_s12, 1024  ;;  %p191_p12 = scmp.lt.s32.totalorder %s27_s12, %s27_s12 }
  0x1a   :  { %p187_p11 = scmp.ne.s32.totalorder %s27_s12, %s186_s30  ;;  %p192_p13 = scmp.lt.s32.totalorder %s186_s30, %s186_s30 }
  0x1c   :  { %p193_p0 = por %p192_p13, %p191_p12 }
  0x1e   :  { %p194_p1 = pnand %p193_p0, %p187_p11 }
  0x20   :  { %197 = shalt.err (!%p194_p1)
}
  0x21   :  { %29 = dma.hbm_to_vmem [thread:$0]  %s281_s1, 1024, %s27_s12, [#allocation6]  }
  0x22   :  { %220 = dma.done.wait [#allocation3], 1024  }
  0x23   :  { %221 = vsyncadd [#allocation3], 4294966272 }
  0x24   :  { %222 = dma.done.wait [#allocation6], 1024  }
  0x25   :  { %223 = vsyncadd [#allocation6], 4294966272  ;;  %v36_v0 = vld [vmem:[#allocation2] sm:$0xff]  ;;  %v37_v1 = vld [vmem:[#allocation2 + $0x8] sm:$0xff]  ;;  %vm116_vm0 = vcmask 7168   ;;  %s228_s1 = smov [#allocation7]  }
  0x26   :  { %v38_v2 = vld [vmem:[#allocation2 + $0x10] sm:$0xff]  ;;  %v39_v3 = vld [vmem:[#allocation2 + $0x18] sm:$0xff]  ;;  %v52_v4 = vmul.f32 %v36_v0, %v36_v0  ;;  %v53_v5 = vmul.f32 %v37_v1, %v37_v1  ;;  %v40_v7 = vld [vmem:[#allocation2 + $0x20] sm:$0xff]  ;;  %s135_s4 = sshll.u32 %s228_s1, 4  ;;  %s136_s4 = int_to_ptr.vmem [resolvable:$true] %s135_s4 }
  0x27   :  { %v54_v6 = vmul.f32 %v38_v2, %v38_v2  ;;  %v44_v8 = vld [vmem:[#allocation5] sm:$0xff]  ;;  %v55_v9 = vmul.f32 %v39_v3, %v39_v3  ;;  %v45_v11 = vld [vmem:[#allocation5 + $0x8] sm:$0xff]  ;;  %v46_v12 = vld [vmem:[#allocation5 + $0x10] sm:$0xff]  ;;  %v56_v19 = vmul.f32 %v40_v7, %v40_v7  ;;  %s198_s6 = scalar_lea.vmem %s136_s4, 16  ;;  %s202_s7 = scalar_lea.vmem %s136_s4, 32 }
  0x28   :  { %v60_v10 = vadd.f32 %v53_v5, %v52_v4  ;;  %v47_v13 = vld [vmem:[#allocation5 + $0x18] sm:$0xff]  ;;  %v69_v14 = vmul.f32 %v44_v8, %v44_v8  ;;  %v41_v15 = vld [vmem:[#allocation2 + $0x28] sm:$0xff]  ;;  %v70_v16 = vmul.f32 %v45_v11, %v45_v11  ;;  %v71_v17 = vmul.f32 %v46_v12, %v46_v12  ;;  %v48_v21 = vld [vmem:[#allocation5 + $0x20] sm:$0xff]  ;;  %p199_p2 = scmp.ne.s32.totalorder %s136_s4, %s198_s6  ;;  %p203_p3 = scmp.lt.s32.totalorder %s136_s4, %s136_s4 }
  0x29   :  { %v86_v18 = vmul.f32 %v44_v8, %v36_v0  ;;  %v42_v22 = vld [vmem:[#allocation2 + $0x30] sm:$0xff]  ;;  %v72_v23 = vmul.f32 %v47_v13, %v47_v13  ;;  %v87_v25 = vmul.f32 %v45_v11, %v37_v1  ;;  %v88_v26 = vmul.f32 %v46_v12, %v38_v2  ;;  %v49_v29 = vld [vmem:[#allocation5 + $0x28] sm:$0xff]  ;;  %v43_v30 = vld [vmem:[#allocation2 + $0x38] sm:$0xff]  ;;  %p204_p4 = scmp.lt.s32.totalorder %s202_s7, %s198_s6 }
  0x2a   :  { %v61_v20 = vadd.f32 %v60_v10, %v54_v6  ;;  %v77_v24 = vadd.f32 %v70_v16, %v69_v14  ;;  %v57_v27 = vmul.f32 %v41_v15, %v41_v15  ;;  %v73_v31 = vmul.f32 %v48_v21, %v48_v21  ;;  %v50_v37 = vld [vmem:[#allocation5 + $0x30] sm:$0xff]  ;;  %v51_v44 = vld [vmem:[#allocation5 + $0x38] sm:$0xff] }
  0x2b   :  { %v89_v33 = vmul.f32 %v47_v13, %v39_v3  ;;  %v94_v34 = vadd.f32 %v87_v25, %v86_v18  ;;  %v58_v35 = vmul.f32 %v42_v22, %v42_v22  ;;  %v74_v38 = vmul.f32 %v49_v29, %v49_v29  ;;  %p205_p5 = por %p204_p4, %p203_p3 }
  0x2c   :  { %v62_v28 = vadd.f32 %v61_v20, %v55_v9  ;;  %v78_v32 = vadd.f32 %v77_v24, %v71_v17  ;;  %v90_v40 = vmul.f32 %v48_v21, %v40_v7  ;;  %v59_v42 = vmul.f32 %v43_v30, %v43_v30 }
  0x2d   :  { %v95_v41 = vadd.f32 %v94_v34, %v88_v26  ;;  %v75_v45 = vmul.f32 %v50_v37, %v50_v37  ;;  %v91_v47 = vmul.f32 %v49_v29, %v41_v15  ;;  %v76_v50 = vmul.f32 %v51_v44, %v51_v44  ;;  %p206_p6 = pnand %p205_p5, %p199_p2 }
  0x2e   :  { %v63_v36 = vadd.f32 %v62_v28, %v56_v19  ;;  %v79_v39 = vadd.f32 %v78_v32, %v72_v23  ;;  %v92_v52 = vmul.f32 %v50_v37, %v42_v22  ;;  %v93_v56 = vmul.f32 %v51_v44, %v43_v30 }
  0x2f   :  { %v96_v48 = vadd.f32 %v95_v41, %v89_v33 }
  0x30   :  { %v64_v43 = vadd.f32 %v63_v36, %v57_v27  ;;  %v80_v46 = vadd.f32 %v79_v39, %v73_v31 }
  0x31   :  { %v97_v53 = vadd.f32 %v96_v48, %v90_v40 }
  0x32   :  { %v65_v49 = vadd.f32 %v64_v43, %v58_v35  ;;  %v81_v51 = vadd.f32 %v80_v46, %v74_v38 }
  0x33   :  { %v98_v57 = vadd.f32 %v97_v53, %v91_v47 }
  0x34   :  { %v66_v54 = vadd.f32 %v65_v49, %v59_v42  ;;  %v82_v55 = vadd.f32 %v81_v51, %v75_v45 }
  0x35   :  { %v99_v59 = vadd.f32 %v98_v57, %v92_v52 }
  0x36   :  { %67 = vadd.xlane.f32.xlu0 %v66_v54  ;;  %v83_v58 = vadd.f32 %v82_v55, %v76_v50 }
  0x37   :  { %v100_v60 = vadd.f32 %v99_v59, %v93_v56 }
  0x39   :  { %101 = vadd.xlane.f32.xlu1 %v100_v60 }
  0x3a   :  { %84 = vadd.xlane.f32.xlu0 %v83_v58 }
  0xc3   :  { %v68_v61 = vpop.xlane.xlu0 %67 }
  0xc4   :  { %v103_v62 = vmax.f32 %v68_v61, 1e-24 }
  0xc6   :  { %150 = vrsqrt.f32 %v103_v62  ;;  %v102_v2 = vpop.xlane.xlu1 %101 }
  0xc7   :  { %v85_v63 = vpop.xlane.xlu0 %84 }
  0xc8   :  { %v106_v0 = vmax.f32 %v85_v63, 1e-24 }
  0xca   :  { %152 = vrsqrt.f32 %v106_v0 }
  0xd0   :  { %v151_v1 = vpop.eup %150 }
  0xd1   :  { %v105_v3 = vmul.f32 %v151_v1, %v102_v2 }
  0xd4   :  { %v153_v4 = vpop.eup %152 }
  0xd5   :  { %v108_v5 = vmul.f32 %v153_v4, %v105_v3 }
  0xd7   :  { %v117_v6 = vsel %vm116_vm0, %v108_v5, 0.0 }
  0xd8   :  { %118 = vadd.xlane.f32.xlu1 %v117_v6 }
 0x165   :  { %v119_v7 = vpop.xlane.xlu1 %118 }
 0x166   :  { %v120_v8 = vrot.slane %v119_v7, 4 }
 0x168   :  { %v121_v9 = vadd.f32 %v120_v8, %v119_v7 }
 0x16a   :  { %v122_v10 = vrot.slane %v121_v9, 2 }
 0x16c   :  { %v123_v11 = vadd.f32 %v122_v10, %v121_v9 }
 0x16e   :  { %v124_v12 = vrot.slane %v123_v11, 1 }
 0x170   :  { %v125_v13 = vadd.f32 %v124_v12, %v123_v11 }
 0x172   :  { %145 = vpush %v125_v13 }
 0x1a3   :  { %s146_s5 = spop %145 }
 0x1a4   :  { %v127_v14 = vstv %s146_s5 }
 0x1a5   :  { %128 = vst [vmem:[#allocation7] sm:$0x1] %v127_v14 }
 0x1a6   :  { %209 = shalt.err (!%p206_p6)
}
 0x1a7   :  { %s210_s10 = scalar_lea.hbm %s282_s2, 16 }
 0x1a8   :  { %p211_p7 = scmp.ne.s32.totalorder %s282_s2, %s210_s10  ;;  %p214_p8 = scmp.lt.u32.totalorder %s210_s10, %s282_s2 }
 0x1aa   :  { %p216_p9 = pnand %p214_p8, %p211_p7 }
 0x1ac   :  { %219 = shalt.err (!%p216_p9)
}
 0x1ad   :  { %138 = dma.vmem_to_hbm [thread:$0]  %s136_s4, 16, %s282_s2, [#allocation4]  }
 0x1ae   :  { %224 = dma.done.wait [#allocation4], 16  }
 0x1af   :  { %225 = vsyncadd [#allocation4], 4294967280 }
 0x1b0   :  { %142 = vsyncpa [#allocation3], 1 }
 0x1b1   :  { %143 = vsyncpa [#allocation6], 1 }
 0x1b2   :  { %144 = vsyncpa [#allocation4], 1 }

</bundles_post_ra>
